<compile_context>
chip_gen: v7x
topology: tpu7x:2x2x1
jax: 0.10.0
libtpu: 0.0.40
codegen_flags: <defaults>
</compile_context>

<pallas_src>
import functools

import numpy as np
import jax
import jax.numpy as jnp
from jax.experimental import pallas as pl
from jax.experimental.pallas import tpu as pltpu

LANE = 128  # feature (output) axes of the weights are padded to a multiple of this


def _round_up(n, m):
    return ((n + m - 1) // m) * m


# --------------------------------------------------------------------------------------
# Kernel: one batch tile of Linear -> ReLU -> Linear -> ReLU -> Linear.
# Matmuls run on the MXU with f32 accumulation; bias-add / ReLU run in f32 on the VPU,
# then activations are cast back to the compute dtype for the next matmul.
# --------------------------------------------------------------------------------------
def mlp_kernel(x_ref, w1_ref, b1_ref, w2_ref, b2_ref, w3_ref, b3_ref, o_ref):
    cdt = w1_ref.dtype                       # compute dtype (bf16 fast path or f32)
    x = x_ref[...].astype(cdt)               # cast the f32 input tile in-VMEM (no wrapper pass)
    # Layer 1: Linear + ReLU
    h1 = jnp.dot(x, w1_ref[...], preferred_element_type=jnp.float32) + b1_ref[...]
    h1 = jnp.maximum(h1, 0.0).astype(cdt)
    # Layer 2: Linear + ReLU
    h2 = jnp.dot(h1, w2_ref[...], preferred_element_type=jnp.float32) + b2_ref[...]
    h2 = jnp.maximum(h2, 0.0).astype(cdt)
    # Layer 3: Linear (logits)
    out = jnp.dot(h2, w3_ref[...], preferred_element_type=jnp.float32) + b3_ref[...]
    o_ref[...] = out.astype(o_ref.dtype)


# --------------------------------------------------------------------------------------
# One-time parameter preparation (do NOT call per forward step).
# --------------------------------------------------------------------------------------
def prepare_params(params, compute_dtype=jnp.bfloat16):
    """Pad the weight output-feature axes to multiples of 128 (lane-dense), cast weights to the
    compute dtype, keep biases f32 (added after f32 MXU accumulation). The contraction (in_dim)
    axis is left unpadded. Zero padding guarantees padded lanes stay zero through ReLU."""
    w1, b1, w2, b2, w3, b3 = (params[k] for k in ("w1", "b1", "w2", "b2", "w3", "b3"))
    in_dim, hid = w1.shape
    out_dim = w3.shape[1]
    hid_p = _round_up(hid, LANE)
    out_p = _round_up(out_dim, LANE)

    def pad2(a, rows, cols, dtype):
        a = a.reshape(1, -1) if a.ndim == 1 else a
        return jnp.zeros((rows, cols), dtype).at[: a.shape[0], : a.shape[1]].set(a.astype(dtype))

    return {
        "w1": pad2(w1, in_dim, hid_p, compute_dtype),   # K axis (in_dim) left unpadded
        "b1": pad2(b1, 1, hid_p, jnp.float32),
        "w2": pad2(w2, hid_p, hid_p, compute_dtype),
        "b2": pad2(b2, 1, hid_p, jnp.float32),
        "w3": pad2(w3, hid_p, out_p, compute_dtype),
        "b3": pad2(b3, 1, out_p, jnp.float32),
        "out_dim": int(out_dim),
    }


# --------------------------------------------------------------------------------------
# Forward
# --------------------------------------------------------------------------------------
@functools.partial(
    jax.jit, static_argnames=("tb", "out_dim", "out_dtype", "single_buffer_weights")
)
def _mlp_forward_padded(x, w1, b1, w2, b2, w3, b3, *, tb, out_dim, out_dtype,
                        single_buffer_weights):
    B, in_dim = x.shape
    hid_p = w1.shape[1]
    out_p = w3.shape[1]
    cdt = w1.dtype

    # ---- batch tile selection ----------------------------------------------------------
    sub = 16 if cdt == jnp.bfloat16 else 8     # bf16 packs 2 rows per sublane
    if B <= sub:
        tb_eff = B                              # single block; block dim == array dim is legal
    else:
        # Big tile for DMA efficiency, but cap at ~half the batch so the "parallel" batch
        # axis always has >= 2 grid steps (keeps both v7x TensorCores busy; free on v5e/v6e).
        tb_eff = min(tb, _round_up(B, sub), _round_up(pl.cdiv(B, 2), sub))
        tb_eff = max(sub, (tb_eff // sub) * sub)
    grid = (pl.cdiv(B, tb_eff),)

    # ---- BlockSpecs ----------------------------------------------------------------------
    # Weights/biases use a constant block index -> DMA'd once and stay VMEM-resident.
    # single_buffer_weights=True additionally drops their pipeline depth to 1 (halves their
    # VMEM footprint); enable for large hidden dims on v7x (64 MiB VMEM).
    const_kw = {"pipeline_mode": pl.Buffered(1)} if single_buffer_weights else {}

    def const_spec(shape):
        return pl.BlockSpec(shape, lambda i: (0, 0), **const_kw)

    in_specs = [
        pl.BlockSpec((tb_eff, in_dim), lambda i: (i, 0)),   # x tile; lane dim == full in_dim
        const_spec((in_dim, hid_p)),
        const_spec((1, hid_p)),
        const_spec((hid_p, hid_p)),
        const_spec((1, hid_p)),
        const_spec((hid_p, out_p)),
        const_spec((1, out_p)),
    ]
    out_spec = pl.BlockSpec((tb_eff, out_p), lambda i: (i, 0))  # lane-dense output slab

    # ---- VMEM budget / compiler params ---------------------------------------------------
    wbuf = 1 if single_buffer_weights else 2
    weight_vmem = wbuf * (cdt.itemsize * (in_dim * hid_p + hid_p * hid_p + hid_p * out_p)
                          + 4 * (2 * hid_p + out_p))
    io_vmem = 2 * tb_eff * (in_dim * x.dtype.itemsize + out_p * np.dtype(out_dtype).itemsize)
    vmem_est = int(weight_vmem + io_vmem) + (2 << 20)       # + headroom
    compiler_kwargs = dict(dimension_semantics=("parallel",))
    if vmem_est > 16 * 1024 * 1024:                          # above v5e's default scoped limit
        compiler_kwargs["vmem_limit_bytes"] = vmem_est
    # TODO(synk): if hid grows until resident weights exceed v7x's 64 MiB VMEM, add a grid axis
    # over hid_p for layers 2/3 with an f32 VMEM accumulator + pl.when init/finalize.

    out_padded = pl.pallas_call(
        mlp_kernel,
        out_shape=jax.ShapeDtypeStruct((B, out_p), out_dtype),
        grid_spec=pltpu.PrefetchScalarGridSpec(
            num_scalar_prefetch=0,
            grid=grid,
            in_specs=in_specs,
            out_specs=out_spec,
        ),
        compiler_params=pltpu.CompilerParams(**compiler_kwargs),
    )(x, w1, b1, w2, b2, w3, b3)

    return out_padded[:, :out_dim]


def mlp_forward(x, prepared, *, tb=512, out_dtype=jnp.float32, single_buffer_weights=False):
    """x: [B, in_dim] float32. prepared: dict from prepare_params (weights pre-padded/cast)."""
    return _mlp_forward_padded(
        x,
        prepared["w1"], prepared["b1"],
        prepared["w2"], prepared["b2"],
        prepared["w3"], prepared["b3"],
        tb=tb,
        out_dim=prepared["out_dim"],
        out_dtype=out_dtype,
        single_buffer_weights=single_buffer_weights,
    )


# --------------------------------------------------------------------------------------
# Init + pure-JAX reference
# --------------------------------------------------------------------------------------
def init_params(key, in_dim, hidden_dim, out_dim):
    """PyTorch nn.Linear-style init U(-1/sqrt(fan_in), 1/sqrt(fan_in)); W stored as
    [in_features, out_features] (transposed vs. PyTorch)."""
    ks = jax.random.split(key, 6)

    def linear(kw, kb, fan_in, fan_out):
        bound = 1.0 / jnp.sqrt(fan_in)
        w = jax.random.uniform(kw, (fan_in, fan_out), jnp.float32, -bound, bound)
        b = jax.random.uniform(kb, (1, fan_out), jnp.float32, -bound, bound)
        return w, b

    w1, b1 = linear(ks[0], ks[1], in_dim, hidden_dim)
    w2, b2 = linear(ks[2], ks[3], hidden_dim, hidden_dim)
    w3, b3 = linear(ks[4], ks[5], hidden_dim, out_dim)
    return {"w1": w1, "b1": b1, "w2": w2, "b2": b2, "w3": w3, "b3": b3}


def mlp_reference(x, params):
    h1 = jnp.maximum(x @ params["w1"] + params["b1"], 0.0)
    h2 = jnp.maximum(h1 @ params["w2"] + params["b2"], 0.0)
    return h2 @ params["w3"] + params["b3"]


if __name__ == "__main__":
    # Small shapes consistent with the module: batch=16, in_dim=64, hidden=32, out_dim=16.
    B, in_dim, hidden_dim, out_dim = 16, 64, 32, 16

    key = jax.random.PRNGKey(0)
    kx, kp = jax.random.split(key)
    x = jax.random.normal(kx, (B, in_dim), dtype=jnp.float32)
    params = init_params(kp, in_dim, hidden_dim, out_dim)

    ref = mlp_reference(x, params)

    # Default fast path on all chips: bf16 weights/activations, f32 MXU accumulation.
    prep_bf16 = prepare_params(params, compute_dtype=jnp.bfloat16)
    out_bf16 = jax.block_until_ready(mlp_forward(x, prep_bf16))
    assert out_bf16.shape == (B, out_dim)
    assert out_bf16.dtype == jnp.float32
    assert jnp.allclose(out_bf16, ref, atol=5e-2, rtol=5e-2), "bf16 Pallas output mismatch vs. reference"

    # f32 compute path (exact parity with the module math).
    prep_f32 = prepare_params(params, compute_dtype=jnp.float32)
    out_f32 = jax.block_until_ready(mlp_forward(x, prep_f32))
    assert out_f32.shape == (B, out_dim)
    assert jnp.allclose(out_f32, ref, atol=1e-5, rtol=1e-5), "f32 Pallas output mismatch vs. reference"

    print("KERNEL_OK")
</pallas_src>

<mosaic_0001>
module attributes {stable_mosaic.version = 11 : i64} {
  func.func @mlp_kernel(%arg0: i32, %arg1: memref<16x64xf32, #tpu.memory_space<vmem>>, %arg2: memref<64x128xbf16, #tpu.memory_space<vmem>>, %arg3: memref<1x128xf32, #tpu.memory_space<vmem>>, %arg4: memref<128x128xbf16, #tpu.memory_space<vmem>>, %arg5: memref<1x128xf32, #tpu.memory_space<vmem>>, %arg6: memref<128x128xbf16, #tpu.memory_space<vmem>>, %arg7: memref<1x128xf32, #tpu.memory_space<vmem>>, %arg8: memref<16x128xf32, #tpu.memory_space<vmem>>) attributes {dimension_semantics = [#tpu.dimension_semantics<parallel>], iteration_bounds = array<i64: 1>, scalar_prefetch = 0 : i64, scratch_operands = 0 : i64, tpu.core_type = #tpu.core_type<tc>, window_params = [{transform_indices = @transform_0, window_bounds = array<i64: 16, 64>}, {pipeline_mode = #tpu.pipeline_mode<synchronous>, transform_indices = @transform_1, window_bounds = array<i64: 64, 128>}, {pipeline_mode = #tpu.pipeline_mode<synchronous>, transform_indices = @transform_2, window_bounds = array<i64: 1, 128>}, {pipeline_mode = #tpu.pipeline_mode<synchronous>, transform_indices = @transform_3, window_bounds = array<i64: 128, 128>}, {pipeline_mode = #tpu.pipeline_mode<synchronous>, transform_indices = @transform_4, window_bounds = array<i64: 1, 128>}, {pipeline_mode = #tpu.pipeline_mode<synchronous>, transform_indices = @transform_5, window_bounds = array<i64: 128, 128>}, {pipeline_mode = #tpu.pipeline_mode<synchronous>, transform_indices = @transform_6, window_bounds = array<i64: 1, 128>}, {transform_indices = @transform_7, window_bounds = array<i64: 16, 128>}]} {
    %c0 = arith.constant 0 : index
    %c0_0 = arith.constant 0 : index
    %0 = vector.load %arg1[%c0, %c0_0] : memref<16x64xf32, #tpu.memory_space<vmem>>, vector<16x64xf32>
    %1 = arith.truncf %0 : vector<16x64xf32> to vector<16x64xbf16>
    %c0_1 = arith.constant 0 : index
    %c0_2 = arith.constant 0 : index
    %2 = vector.load %arg2[%c0_1, %c0_2] : memref<64x128xbf16, #tpu.memory_space<vmem>>, vector<64x128xbf16>
    %cst = arith.constant dense<0.000000e+00> : vector<16x128xf32>
    %3 = tpu.matmul %1, %2, %cst {dimension_numbers = #tpu.dot_dimension_numbers<[1], [0], [0], [1], [0, 0, 1, 1], [], []>} : vector<16x64xbf16>, vector<64x128xbf16>, vector<16x128xf32> -> vector<16x128xf32>
    %c0_3 = arith.constant 0 : index
    %c0_4 = arith.constant 0 : index
    %4 = vector.load %arg3[%c0_3, %c0_4] : memref<1x128xf32, #tpu.memory_space<vmem>>, vector<1x128xf32>
    %5 = vector.broadcast %4 : vector<1x128xf32> to vector<16x128xf32>
    %6 = arith.addf %3, %5 : vector<16x128xf32>
    %cst_5 = arith.constant 0.000000e+00 : f32
    %7 = vector.broadcast %cst_5 : f32 to vector<16x128xf32>
    %8 = arith.maximumf %6, %7 : vector<16x128xf32>
    %9 = arith.truncf %8 : vector<16x128xf32> to vector<16x128xbf16>
    %c0_6 = arith.constant 0 : index
    %c0_7 = arith.constant 0 : index
    %10 = vector.load %arg4[%c0_6, %c0_7] : memref<128x128xbf16, #tpu.memory_space<vmem>>, vector<128x128xbf16>
    %cst_8 = arith.constant dense<0.000000e+00> : vector<16x128xf32>
    %11 = tpu.matmul %9, %10, %cst_8 {dimension_numbers = #tpu.dot_dimension_numbers<[1], [0], [0], [1], [0, 0, 1, 1], [], []>} : vector<16x128xbf16>, vector<128x128xbf16>, vector<16x128xf32> -> vector<16x128xf32>
    %c0_9 = arith.constant 0 : index
    %c0_10 = arith.constant 0 : index
    %12 = vector.load %arg5[%c0_9, %c0_10] : memref<1x128xf32, #tpu.memory_space<vmem>>, vector<1x128xf32>
    %13 = vector.broadcast %12 : vector<1x128xf32> to vector<16x128xf32>
    %14 = arith.addf %11, %13 : vector<16x128xf32>
    %cst_11 = arith.constant 0.000000e+00 : f32
    %15 = vector.broadcast %cst_11 : f32 to vector<16x128xf32>
    %16 = arith.maximumf %14, %15 : vector<16x128xf32>
    %17 = arith.truncf %16 : vector<16x128xf32> to vector<16x128xbf16>
    %c0_12 = arith.constant 0 : index
    %c0_13 = arith.constant 0 : index
    %18 = vector.load %arg6[%c0_12, %c0_13] : memref<128x128xbf16, #tpu.memory_space<vmem>>, vector<128x128xbf16>
    %cst_14 = arith.constant dense<0.000000e+00> : vector<16x128xf32>
    %19 = tpu.matmul %17, %18, %cst_14 {dimension_numbers = #tpu.dot_dimension_numbers<[1], [0], [0], [1], [0, 0, 1, 1], [], []>} : vector<16x128xbf16>, vector<128x128xbf16>, vector<16x128xf32> -> vector<16x128xf32>
    %c0_15 = arith.constant 0 : index
    %c0_16 = arith.constant 0 : index
    %20 = vector.load %arg7[%c0_15, %c0_16] : memref<1x128xf32, #tpu.memory_space<vmem>>, vector<1x128xf32>
    %21 = vector.broadcast %20 : vector<1x128xf32> to vector<16x128xf32>
    %22 = arith.addf %19, %21 : vector<16x128xf32>
    %c0_17 = arith.constant 0 : index
    %c0_18 = arith.constant 0 : index
    %23 = vector.load %arg8[%c0_17, %c0_18] : memref<16x128xf32, #tpu.memory_space<vmem>>, vector<16x128xf32>
    tpu.vector_store %arg8[%c0_17, %c0_18], %22 {strides = array<i32>} : memref<16x128xf32, #tpu.memory_space<vmem>>, vector<16x128xf32>,
    return
  }
  func.func @transform_0(%arg0: i32) -> (i32, i32) {
    %c0_i32 = arith.constant 0 : i32
    %c0_i32_0 = arith.constant 0 : i32
    return %arg0, %c0_i32 : i32, i32
  }
  func.func @transform_1(%arg0: i32) -> (i32, i32) {
    %c0_i32 = arith.constant 0 : i32
    %c0_i32_0 = arith.constant 0 : i32
    %c0_i32_1 = arith.constant 0 : i32
    return %c0_i32, %c0_i32_0 : i32, i32
  }
  func.func @transform_2(%arg0: i32) -> (i32, i32) {
    %c0_i32 = arith.constant 0 : i32
    %c0_i32_0 = arith.constant 0 : i32
    %c0_i32_1 = arith.constant 0 : i32
    return %c0_i32, %c0_i32_0 : i32, i32
  }
  func.func @transform_3(%arg0: i32) -> (i32, i32) {
    %c0_i32 = arith.constant 0 : i32
    %c0_i32_0 = arith.constant 0 : i32
    %c0_i32_1 = arith.constant 0 : i32
    return %c0_i32, %c0_i32_0 : i32, i32
  }
  func.func @transform_4(%arg0: i32) -> (i32, i32) {
    %c0_i32 = arith.constant 0 : i32
    %c0_i32_0 = arith.constant 0 : i32
    %c0_i32_1 = arith.constant 0 : i32
    return %c0_i32, %c0_i32_0 : i32, i32
  }
  func.func @transform_5(%arg0: i32) -> (i32, i32) {
    %c0_i32 = arith.constant 0 : i32
    %c0_i32_0 = arith.constant 0 : i32
    %c0_i32_1 = arith.constant 0 : i32
    return %c0_i32, %c0_i32_0 : i32, i32
  }
  func.func @transform_6(%arg0: i32) -> (i32, i32) {
    %c0_i32 = arith.constant 0 : i32
    %c0_i32_0 = arith.constant 0 : i32
    %c0_i32_1 = arith.constant 0 : i32
    return %c0_i32, %c0_i32_0 : i32, i32
  }
  func.func @transform_7(%arg0: i32) -> (i32, i32) {
    %c0_i32 = arith.constant 0 : i32
    %c0_i32_0 = arith.constant 0 : i32
    return %arg0, %c0_i32 : i32, i32
  }
}

</mosaic_0001>

<bundles_post_ra>
// kernel: _mlp_forward_padded.1
= control target key start
LH: loop header
LB: loop body
LE: loop exit
PB: predicated region body
PF: predicated region fallthrough
CT: control target
= control target key end

     0   :  { %12 = vsyncpa [#allocation3], 0  ;;  %s837_s0 = inlined_call_operand.hbm [shape: f32[16,64], index: 0, kind: input, shape index: {}]   ;;  %s838_s1 = inlined_call_operand.hbm [shape: bf16[64,128], index: 1, kind: input, shape index: {}]   ;;  %s839_s2 = inlined_call_operand.vmem [shape: f32[1,128], index: 2, kind: input, shape index: {}]   ;;  %s840_s3 = inlined_call_operand.hbm [shape: bf16[128,128], index: 3, kind: input, shape index: {}]   ;;  %s841_s4 = inlined_call_operand.vmem [shape: f32[1,128], index: 4, kind: input, shape index: {}]   ;;  %s842_s5 = inlined_call_operand.hbm [shape: bf16[128,128], index: 5, kind: input, shape index: {}]   ;;  %s843_s6 = inlined_call_operand.vmem [shape: f32[1,128], index: 6, kind: input, shape index: {}]   ;;  %s844_s7 = inlined_call_operand.hbm [shape: f32[16,128], index: 7, kind: output, shape index: {}]  }
   0x1   :  { %13 = vsyncpa [#allocation6], 0 }
   0x2   :  { %14 = vsyncpa [#allocation9], 0 }
   0x3   :  { %15 = vsyncpa [#allocation4], 0  ;;  %s669_s24 = smov [#allocation5]   ;;  %s551_s28 = scalar_lea.hbm %s838_s1, 512 }
   0x4   :  { %s33_s25 = sshll.u32 %s669_s24, 4  ;;  %p552_p0 = scmp.ne.s32.totalorder %s838_s1, %s551_s28  ;;  %s34_s25 = int_to_ptr.vmem [resolvable:$true] %s33_s25 }
   0x5   :  { %p555_p1 = scmp.lt.u32.totalorder %s551_s28, %s838_s1 }
   0x7   :  { %p557_p2 = pnand %p555_p1, %p552_p0 }
   0x9   :  { %560 = shalt.err (!%p557_p2)
}
   0xa   :  { %s561_s10 = scalar_lea.vmem %s34_s25, 512  ;;  %p566_p4 = scmp.lt.s32.totalorder %s34_s25, %s34_s25 }
   0xb   :  { %p562_p3 = scmp.ne.s32.totalorder %s34_s25, %s561_s10  ;;  %p567_p5 = scmp.lt.s32.totalorder %s561_s10, %s561_s10 }
   0xd   :  { %p568_p6 = por %p567_p5, %p566_p4 }
   0xf   :  { %p569_p7 = pnand %p568_p6, %p562_p3 }
  0x11   :  { %572 = shalt.err (!%p569_p7)
}
  0x12   :  { %s670_s11 = smov 64   ;;  %s671_s12 = smov 4  }
  0x13   :  { %39 = dma.hbm_to_vmem [thread:$0]  %s838_s1, 512, %s34_s25, [#allocation6], %s670_s11, %s670_s11, %s671_s12  }
  0x14   :  { %s672_s15 = smov [#allocation2]   ;;  %s573_s19 = scalar_lea.hbm %s837_s0, 256 }
  0x15   :  { %s21_s16 = sshll.u32 %s672_s15, 4  ;;  %p574_p8 = scmp.ne.s32.totalorder %s837_s0, %s573_s19  ;;  %s22_s16 = int_to_ptr.vmem [resolvable:$true] %s21_s16 }
  0x16   :  { %p577_p9 = scmp.lt.u32.totalorder %s573_s19, %s837_s0 }
  0x18   :  { %p579_p10 = pnand %p577_p9, %p574_p8 }
  0x1a   :  { %582 = shalt.err (!%p579_p10)
}
  0x1b   :  { %s583_s24 = scalar_lea.vmem %s22_s16, 256  ;;  %p588_p12 = scmp.lt.s32.totalorder %s22_s16, %s22_s16 }
  0x1c   :  { %p584_p11 = scmp.ne.s32.totalorder %s22_s16, %s583_s24  ;;  %p589_p13 = scmp.lt.s32.totalorder %s583_s24, %s583_s24 }
  0x1e   :  { %p590_p0 = por %p589_p13, %p588_p12 }
  0x20   :  { %p591_p1 = pnand %p590_p0, %p584_p11 }
  0x22   :  { %594 = shalt.err (!%p591_p1)
}
  0x23   :  { %s673_s1 = smov 128   ;;  %s674_s25 = smov 8  }
  0x24   :  { %27 = dma.hbm_to_vmem [thread:$0]  %s837_s0, 256, %s22_s16, [#allocation3], %s673_s1, %s673_s1, %s674_s25  }
  0x25   :  { %s675_s28 = smov [#allocation7]   ;;  %s676_s30 = smov [#allocation8]  }
  0x26   :  { %s47_s29 = sshll.u32 %s675_s28, 4  ;;  %s61_s8 = sshll.u32 %s676_s30, 4  ;;  %s48_s29 = int_to_ptr.vmem [resolvable:$true] %s47_s29  ;;  %s750_s8 = int_to_ptr.vmem [resolvable:$true] %s61_s8 }
  0x27   :  { %s595_s13 = scalar_lea.hbm %s840_s3, 1024 }
  0x28   :  { %p596_p2 = scmp.ne.s32.totalorder %s840_s3, %s595_s13  ;;  %p599_p3 = scmp.lt.u32.totalorder %s595_s13, %s840_s3 }
  0x2a   :  { %p601_p4 = pnand %p599_p3, %p596_p2 }
  0x2c   :  { %604 = shalt.err (!%p601_p4)
}
  0x2d   :  { %s605_s0 = scalar_lea.vmem %s48_s29, 1024  ;;  %p610_p6 = scmp.lt.s32.totalorder %s48_s29, %s48_s29 }
  0x2e   :  { %p606_p5 = scmp.ne.s32.totalorder %s48_s29, %s605_s0  ;;  %p611_p7 = scmp.lt.s32.totalorder %s605_s0, %s605_s0 }
  0x30   :  { %p612_p8 = por %p611_p7, %p610_p6 }
  0x32   :  { %p613_p9 = pnand %p612_p8, %p606_p5 }
  0x34   :  { %616 = shalt.err (!%p613_p9)
}
  0x35   :  { %53 = dma.hbm_to_vmem [thread:$0]  %s840_s3, 1024, %s48_s29, [#allocation6], %s670_s11, %s670_s11, %s671_s12  }
  0x36   :  { %s617_s22 = scalar_lea.hbm %s842_s5, 1024 }
  0x37   :  { %p618_p10 = scmp.ne.s32.totalorder %s842_s5, %s617_s22  ;;  %p621_p11 = scmp.lt.u32.totalorder %s617_s22, %s842_s5 }
  0x39   :  { %p623_p12 = pnand %p621_p11, %p618_p10 }
  0x3b   :  { %626 = shalt.err (!%p623_p12)
}
  0x3c   :  { %s627_s28 = scalar_lea.vmem %s750_s8, 1024  ;;  %p632_p0 = scmp.lt.s32.totalorder %s750_s8, %s750_s8 }
  0x3d   :  { %p628_p13 = scmp.ne.s32.totalorder %s750_s8, %s627_s28  ;;  %p633_p1 = scmp.lt.s32.totalorder %s627_s28, %s627_s28 }
  0x3f   :  { %p634_p2 = por %p633_p1, %p632_p0 }
  0x41   :  { %p635_p3 = pnand %p634_p2, %p628_p13 }
  0x43   :  { %638 = shalt.err (!%p635_p3)
}
  0x44   :  { %67 = dma.hbm_to_vmem [thread:$0]  %s842_s5, 1024, %s750_s8, [#allocation9], %s670_s11, %s670_s11, %s671_s12  }
  0x45   :  { %661 = dma.done.wait [#allocation3], 256  }
  0x46   :  { %662 = vsyncadd [#allocation3], 4294967040 }
  0x47   :  { %663 = dma.done.wait [#allocation6], 1536  }
  0x48   :  { %664 = vsyncadd [#allocation6], 4294965760 }
  0x49   :  { %665 = dma.done.wait [#allocation9], 1024  }
  0x4a   :  { %666 = vsyncadd [#allocation9], 4294966272  ;;  %v677_v0 = vmov 0.0   ;;  %vm678_vm0 = vmmov 0   ;;  %v531_v1 = vld [vmem:[#allocation5] sm:$0xff]   ;;  %v532_v2 = vld [vmem:[#allocation5 + $0x8] sm:$0xff]  }
  0x4b   :  { %468 = vmatprep.subr.bf16.mxu0 %v677_v0  ;;  %476 = vmatprep.mubr.msk.bf16.mxu0 %vm678_vm0, %v677_v0  ;;  %v535_v3 = vld [vmem:[#allocation7] sm:$0xff]   ;;  %v533_v4 = vld [vmem:[#allocation5 + $0x10] sm:$0xff]   ;;  %v536_v5 = vld [vmem:[#allocation7 + $0x8] sm:$0xff]   ;;  %vm125_vm1 = vcmask 523264   ;;  %s679_s9 = smov [#allocation10]  }
  0x4c   :  { %480 = vmatprep.subr.bf16.mxu1 %v677_v0  ;;  %496 = vmatprep.mubr.msk.bf16.mxu1 %vm678_vm0, %v677_v0  ;;  %v534_v6 = vld [vmem:[#allocation5 + $0x18] sm:$0xff]   ;;  %v83_v7 = vld [vmem:[#allocation2] sm:$0xff]  ;;  %v539_v12 = vld [vmem:[#allocation7 + $0x20] sm:$0xff]   ;;  %s407_s10 = sshll.u32 %s679_s9, 4  ;;  %s408_s10 = int_to_ptr.vmem [resolvable:$true] %s407_s10 }
  0x4d   :  { %469 = vmatpush3.bf16.msra.mxu0 %v531_v1  ;;  %481 = vmatpush3.bf16.msra.mxu1 %v535_v3  ;;  %v84_v8 = vld [vmem:[#allocation2 + $0x8] sm:$0xff]  ;;  %v537_v9 = vld [vmem:[#allocation7 + $0x10] sm:$0xff]   ;;  %v540_v13 = vld [vmem:[#allocation7 + $0x28] sm:$0xff]   ;;  %p644_p5 = scmp.lt.s32.totalorder %s408_s10, %s408_s10 }
  0x4e   :  { %470 = vmatprep.subr.bf16.mxu0 %v677_v0  ;;  %482 = vmatprep.subr.bf16.mxu1 %v677_v0  ;;  %v85_v10 = vpack.c.bf16 %v84_v8, %v83_v7  ;;  %v538_v11 = vld [vmem:[#allocation7 + $0x18] sm:$0xff]   ;;  %v541_v14 = vld [vmem:[#allocation7 + $0x30] sm:$0xff]   ;;  %v543_v16 = vld [vmem:[#allocation8] sm:$0xff]  }
  0x4f   :  { %v542_v15 = vld [vmem:[#allocation7 + $0x38] sm:$0xff]   ;;  %v544_v17 = vld [vmem:[#allocation8 + $0x8] sm:$0xff]   ;;  %v545_v18 = vld [vmem:[#allocation8 + $0x10] sm:$0xff]  }
  0x50   :  { %v546_v19 = vld [vmem:[#allocation8 + $0x18] sm:$0xff]   ;;  %v547_v20 = vld [vmem:[#allocation8 + $0x20] sm:$0xff]   ;;  %v548_v21 = vld [vmem:[#allocation8 + $0x28] sm:$0xff]  }
  0x51   :  { %471 = vmatpush3.bf16.msra.mxu0 %v532_v2  ;;  %483 = vmatpush3.bf16.msra.mxu1 %v536_v5  ;;  %v421_v22 = vld [vmem:[%s839_s2] ss:$0 sm:$0xff]  ;;  %v550_v33 = vld [vmem:[#allocation8 + $0x38] sm:$0xff]  }
  0x52   :  { %472 = vmatprep.subr.bf16.mxu0 %v677_v0  ;;  %484 = vmatprep.subr.bf16.mxu1 %v677_v0  ;;  %v549_v32 = vld [vmem:[#allocation8 + $0x30] sm:$0xff]  }
  0x53   :  { %v427_v34 = vld [vmem:[%s841_s4] ss:$0 sm:$0xff]  ;;  %s639_s4 = scalar_lea.vmem %s408_s10, 256 }
  0x54   :  { %v436_v44 = vld [vmem:[%s843_s6] ss:$0 sm:$0xff]  ;;  %p640_p4 = scmp.ne.s32.totalorder %s408_s10, %s639_s4  ;;  %p645_p6 = scmp.lt.s32.totalorder %s639_s4, %s639_s4 }
  0x55   :  { %473 = vmatpush3.bf16.msra.mxu0 %v533_v4  ;;  %485 = vmatpush3.bf16.msra.mxu1 %v537_v9 }
  0x56   :  { %474 = vmatprep.subr.bf16.mxu0 %v677_v0  ;;  %486 = vmatprep.subr.bf16.mxu1 %v677_v0  ;;  %p646_p7 = por %p645_p6, %p644_p5 }
  0x58   :  { %p647_p8 = pnand %p646_p7, %p640_p4 }
  0x59   :  { %475 = vmatpush3.bf16.msra.mxu0 %v534_v6  ;;  %487 = vmatpush3.bf16.msra.mxu1 %v538_v11 }
  0x5a   :  { %500 = vmatprep.subr.bf16.mxu0 %v677_v0  ;;  %488 = vmatprep.subr.bf16.mxu1 %v677_v0 }
  0x5c   :  { %477 = vmatmul.mubr.msk.bf16.vlgmr.msra.gmra.mrb[0].mxu0 %vm125_vm1, %v85_v10 }
  0x5d   :  { %516 = vmatprep.mubr.msk.bf16.mxu0 %vm678_vm0, %v677_v0  ;;  %489 = vmatpush3.bf16.msra.mxu1 %v539_v12 }
  0x5e   :  { %490 = vmatprep.subr.bf16.mxu1 %v677_v0  ;;  %501 = vmatpush3.bf16.msra.mxu0 %v543_v16 }
  0x5f   :  { %502 = vmatprep.subr.bf16.mxu0 %v677_v0 }
  0x61   :  { %491 = vmatpush3.bf16.msra.mxu1 %v540_v13 }
  0x62   :  { %492 = vmatprep.subr.bf16.mxu1 %v677_v0  ;;  %503 = vmatpush3.bf16.msra.mxu0 %v544_v17 }
  0x63   :  { %504 = vmatprep.subr.bf16.mxu0 %v677_v0 }
  0x65   :  { %493 = vmatpush3.bf16.msra.mxu1 %v541_v14 }
  0x66   :  { %494 = vmatprep.subr.bf16.mxu1 %v677_v0  ;;  %505 = vmatpush3.bf16.msra.mxu0 %v545_v18 }
  0x67   :  { %506 = vmatprep.subr.bf16.mxu0 %v677_v0 }
  0x69   :  { %495 = vmatpush3.bf16.msra.mxu1 %v542_v15 }
  0x6a   :  { %507 = vmatpush3.bf16.msra.mxu0 %v546_v19 }
  0x6b   :  { %508 = vmatprep.subr.bf16.mxu0 %v677_v0 }
  0x6e   :  { %509 = vmatpush3.bf16.msra.mxu0 %v547_v20 }
  0x6f   :  { %510 = vmatprep.subr.bf16.mxu0 %v677_v0 }
  0x72   :  { %511 = vmatpush3.bf16.msra.mxu0 %v548_v21 }
  0x73   :  { %512 = vmatprep.subr.bf16.mxu0 %v677_v0 }
  0x76   :  { %513 = vmatpush3.bf16.msra.mxu0 %v549_v32 }
  0x77   :  { %514 = vmatprep.subr.bf16.mxu0 %v677_v0 }
  0x7a   :  { %515 = vmatpush3.bf16.msra.mxu0 %v550_v33 }
 0x12f   :  { %v163_v23 = vpop.f32.mrb[0].mxu0 }
 0x130   :  { %v164_v24 = vadd.f32 %v421_v22, %v163_v23  ;;  %v478_v25 = vpop.f32.mrb[1].mxu0 }
 0x131   :  { %v166_v26 = vpop.f32.mrb[2].mxu0 }
 0x132   :  { %v167_v27 = vadd.f32 %v421_v22, %v166_v26  ;;  %v479_v28 = vpop.f32.mrb[3].mxu0  ;;  %v170_v29 = vmax.f32 %v164_v24, 0.0 }
 0x134   :  { %v171_v30 = vmax.f32 %v167_v27, 0.0 }
 0x136   :  { %v172_v31 = vpack.c.bf16 %v171_v30, %v170_v29 }
 0x138   :  { %497 = vmatmul.mubr.bf16.vlgmr.msra.gmra.mrb[0].mxu1 %v172_v31 }
 0x20b   :  { %v278_v35 = vpop.f32.mrb[0].mxu1 }
 0x20c   :  { %v279_v36 = vadd.f32 %v427_v34, %v278_v35  ;;  %v498_v37 = vpop.f32.mrb[1].mxu1 }
 0x20d   :  { %v281_v38 = vpop.f32.mrb[2].mxu1 }
 0x20e   :  { %v282_v39 = vadd.f32 %v427_v34, %v281_v38  ;;  %v499_v40 = vpop.f32.mrb[3].mxu1  ;;  %v285_v41 = vmax.f32 %v279_v36, 0.0 }
 0x210   :  { %v286_v42 = vmax.f32 %v282_v39, 0.0 }
 0x212   :  { %v287_v43 = vpack.c.bf16 %v286_v42, %v285_v41 }
 0x214   :  { %517 = vmatmul.mubr.bf16.vlgmr.msra.gmra.mrb[4].mxu0 %v287_v43 }
 0x2e7   :  { %v393_v45 = vpop.f32.mrb[4].mxu0 }
 0x2e8   :  { %v394_v46 = vadd.f32 %v436_v44, %v393_v45  ;;  %v518_v47 = vpop.f32.mrb[5].mxu0 }
 0x2e9   :  { %v396_v48 = vpop.f32.mrb[6].mxu0 }
 0x2ea   :  { %400 = vst [vmem:[#allocation10] sm:$0xff] %v394_v46  ;;  %v397_v49 = vadd.f32 %v436_v44, %v396_v48  ;;  %v519_v50 = vpop.f32.mrb[7].mxu0 }
 0x2ec   :  { %401 = vst [vmem:[#allocation10 + $0x8] sm:$0xff] %v397_v49 }
 0x2ed   :  { %650 = shalt.err (!%p647_p8)
}
 0x2ee   :  { %s651_s14 = scalar_lea.hbm %s844_s7, 256 }
 0x2ef   :  { %p652_p9 = scmp.ne.s32.totalorder %s844_s7, %s651_s14  ;;  %p655_p10 = scmp.lt.u32.totalorder %s651_s14, %s844_s7 }
 0x2f1   :  { %p657_p11 = pnand %p655_p10, %p652_p9 }
 0x2f3   :  { %660 = shalt.err (!%p657_p11)
}
 0x2f4   :  { %413 = dma.vmem_to_hbm [thread:$0]  %s408_s10, 256, %s844_s7, [#allocation4], %s673_s1, %s673_s1, %s674_s25  }
 0x2f5   :  { %667 = dma.done.wait [#allocation4], 256  }
 0x2f6   :  { %668 = vsyncadd [#allocation4], 4294967040 }
 0x2f7   :  { %417 = vsyncpa [#allocation3], 1 }
 0x2f8   :  { %418 = vsyncpa [#allocation6], 1 }
 0x2f9   :  { %419 = vsyncpa [#allocation9], 1 }
 0x2fa   :  { %420 = vsyncpa [#allocation4], 1 }

</bundles_post_ra>
